<compile_context>
chip_gen: v7x
topology: tpu7x:2x2x1
jax: 0.10.0
libtpu: 0.0.40
codegen_flags: <defaults>
</compile_context>

<pallas_src>
import functools

import jax
import jax.numpy as jnp
from jax import lax
from jax.experimental import pallas as pl
from jax.experimental.pallas import tpu as pltpu


VMEM_LIMIT_BYTES = 32 * 1024 * 1024  # safe on v5e/v6e (128 MiB) and v7x (64 MiB)


def _pick_tile(dim, preferred, multiple):
    """Largest tile <= preferred that divides `dim` and is a multiple of
    `multiple`; falls back to the full dim (block == full array dim is legal)."""
    if dim <= preferred:
        return dim
    t = (preferred // multiple) * multiple
    while t >= multiple:
        if dim % t == 0:
            return t
        t -= multiple
    return dim


# ----------------------------------------------------------------------------
# Tiled matmul kernels (bf16 MXU operands, f32 accumulator, optional bias)
# ----------------------------------------------------------------------------
def _matmul_kernel(x_ref, w_ref, o_ref, acc_ref):
    @pl.when(pl.program_id(2) == 0)
    def _():
        acc_ref[...] = jnp.zeros_like(acc_ref)

    acc_ref[...] += jnp.dot(
        x_ref[...].astype(jnp.bfloat16),
        w_ref[...].astype(jnp.bfloat16),
        preferred_element_type=jnp.float32)

    @pl.when(pl.program_id(2) == pl.num_programs(2) - 1)
    def _():
        o_ref[...] = acc_ref[...].astype(o_ref.dtype)


def _matmul_bias_kernel(x_ref, w_ref, b_ref, o_ref, acc_ref):
    @pl.when(pl.program_id(2) == 0)
    def _():
        acc_ref[...] = jnp.zeros_like(acc_ref)

    acc_ref[...] += jnp.dot(
        x_ref[...].astype(jnp.bfloat16),
        w_ref[...].astype(jnp.bfloat16),
        preferred_element_type=jnp.float32)

    @pl.when(pl.program_id(2) == pl.num_programs(2) - 1)
    def _():
        o_ref[...] = (acc_ref[...] + b_ref[...]).astype(o_ref.dtype)


def tiled_matmul(x, w, bias=None, *, out_dtype, tm=256, tn=256, tk=512):
    """out = x @ w (+ bias), tiled for the MXU with an f32 accumulator."""
    M, K = x.shape
    K2, N = w.shape
    assert K == K2
    tm = _pick_tile(M, tm, 8)
    tn = _pick_tile(N, tn, 128)
    tk = _pick_tile(K, tk, 128)
    grid = (M // tm, N // tn, K // tk)

    in_specs = [
        pl.BlockSpec((tm, tk), lambda i, j, k: (i, k)),
        pl.BlockSpec((tk, tn), lambda i, j, k: (k, j)),
    ]
    args = [x, w]
    if bias is not None:
        in_specs.append(pl.BlockSpec((1, tn), lambda i, j, k: (0, j)))
        args.append(bias.reshape(1, N))
        kernel = _matmul_bias_kernel
    else:
        kernel = _matmul_kernel

    return pl.pallas_call(
        kernel,
        out_shape=jax.ShapeDtypeStruct((M, N), out_dtype),
        grid_spec=pltpu.PrefetchScalarGridSpec(
            num_scalar_prefetch=0,
            grid=grid,
            in_specs=in_specs,
            out_specs=pl.BlockSpec((tm, tn), lambda i, j, k: (i, j)),
            scratch_shapes=[pltpu.VMEM((tm, tn), jnp.float32)],
        ),
        compiler_params=pltpu.CompilerParams(
            dimension_semantics=("parallel", "parallel", "arbitrary"),
            vmem_limit_bytes=VMEM_LIMIT_BYTES),
    )(*args)


# ----------------------------------------------------------------------------
# Flash attention kernel: all heads per grid step, online softmax over KV tiles
# ----------------------------------------------------------------------------
def _attn_kernel(q_ref, k_ref, v_ref, o_ref, m_sc, l_sc, acc_sc, *, heads, d_head):
    kv = pl.program_id(2)

    @pl.when(kv == 0)
    def _():
        m_sc[...] = jnp.full_like(m_sc, -jnp.inf)
        l_sc[...] = jnp.zeros_like(l_sc)
        acc_sc[...] = jnp.zeros_like(acc_sc)

    q = q_ref[...]          # (H, TQ, D)  bf16 (softmax scale folded into Wq)
    k = k_ref[...]          # (H, TKV, D) bf16
    # q @ k^T contracting d_head on both operands directly — no k.T copy.
    s = lax.dot_general(q, k, (((2,), (2,)), ((0,), (0,))),
                        preferred_element_type=jnp.float32)   # (H, TQ, TKV) f32

    m_prev = m_sc[...]
    m_new = jnp.maximum(m_prev, jnp.max(s, axis=-1, keepdims=True))
    alpha = jnp.exp(m_prev - m_new)
    p = jnp.exp(s - m_new)                                     # f32 softmax math
    l_sc[...] = alpha * l_sc[...] + jnp.sum(p, axis=-1, keepdims=True)
    pv = lax.dot_general(p.astype(jnp.bfloat16), v_ref[...],
                         (((2,), (1,)), ((0,), (0,))),
                         preferred_element_type=jnp.float32)   # (H, TQ, D) f32
    acc_sc[...] = alpha * acc_sc[...] + pv
    m_sc[...] = m_new

    @pl.when(kv == pl.num_programs(2) - 1)
    def _():
        inv_l = pl.reciprocal(l_sc[...], approx=True)          # EUP, frees VALU
        out = acc_sc[...] * inv_l                              # (H, TQ, D) f32
        # Scatter heads into the lane-dense (TQ, H*D) output block (static unroll,
        # once per q tile); HBM writeback is one full-width block DMA.
        for h in range(heads):
            o_ref[:, h * d_head:(h + 1) * d_head] = out[h].astype(o_ref.dtype)


def flash_attention(qkv5, *, tq=128, tkv=256):
    """qkv5: (B, 3, H, N, D) bf16 — returns (B, N, H*D) bf16."""
    B, three, H, N, D = qkv5.shape
    assert three == 3
    inner = H * D
    tq = _pick_tile(N, tq, 8)
    tkv = _pick_tile(N, tkv, 8)
    grid = (B, N // tq, N // tkv)

    q_spec = pl.BlockSpec((None, None, H, tq, D), lambda b, qi, ki: (b, 0, 0, qi, 0))
    k_spec = pl.BlockSpec((None, None, H, tkv, D), lambda b, qi, ki: (b, 1, 0, ki, 0))
    v_spec = pl.BlockSpec((None, None, H, tkv, D), lambda b, qi, ki: (b, 2, 0, ki, 0))
    out_spec = pl.BlockSpec((None, tq, inner), lambda b, qi, ki: (b, qi, 0))

    return pl.pallas_call(
        functools.partial(_attn_kernel, heads=H, d_head=D),
        out_shape=jax.ShapeDtypeStruct((B, N, inner), jnp.bfloat16),
        grid_spec=pltpu.PrefetchScalarGridSpec(
            num_scalar_prefetch=0,
            grid=grid,
            in_specs=[q_spec, k_spec, v_spec],
            out_specs=out_spec,
            scratch_shapes=[
                pltpu.VMEM((H, tq, 1), jnp.float32),   # running max
                pltpu.VMEM((H, tq, 1), jnp.float32),   # running sum
                pltpu.VMEM((H, tq, D), jnp.float32),   # output accumulator
            ],
        ),
        compiler_params=pltpu.CompilerParams(
            dimension_semantics=("parallel", "parallel", "arbitrary"),
            vmem_limit_bytes=VMEM_LIMIT_BYTES),
    )(qkv5, qkv5, qkv5)


# ----------------------------------------------------------------------------
# Module forward
# ----------------------------------------------------------------------------
def ldm_self_attn_forward(x, w_q, w_k, w_v, w_o, b_o, heads):
    """x: (B, N, query_dim). Weights in math layout (in, out) == torch weight.T."""
    B, N, Dq = x.shape
    inner = w_q.shape[1]
    assert inner % heads == 0
    d_head = inner // heads
    scale = d_head ** (-0.5)

    # Weight prep (once): fold softmax scale into Wq, fuse QKV, cast to bf16.
    w_qkv = jnp.concatenate([w_q * scale, w_k, w_v], axis=1).astype(jnp.bfloat16)
    w_o_bf = w_o.astype(jnp.bfloat16)

    # 1) Fused QKV projection: (B*N, Dq) @ (Dq, 3*inner) -> bf16.
    x2d = x.reshape(B * N, Dq)
    qkv2d = tiled_matmul(x2d, w_qkv, out_dtype=jnp.bfloat16)

    # 2) Single relayout so (seq, d_head) are the matmul-friendly minor dims
    #    inside the attention kernel (free reshape + one XLA transpose).
    qkv5 = qkv2d.reshape(B, N, 3, heads, d_head).transpose(0, 2, 3, 1, 4)

    # 3) Flash attention; output is lane-dense (B, N, heads*d_head).
    attn = flash_attention(qkv5)

    # 4) to_out projection with bias, f32 result.
    out = tiled_matmul(attn.reshape(B * N, inner), w_o_bf, bias=b_o,
                       out_dtype=x.dtype)
    return out.reshape(B, N, Dq)


def reference_forward(x, w_q, w_k, w_v, w_o, b_o, heads):
    B, N, Dq = x.shape
    inner = w_q.shape[1]
    d_head = inner // heads
    scale = d_head ** (-0.5)
    q = (x @ w_q).reshape(B, N, heads, d_head).transpose(0, 2, 1, 3)
    k = (x @ w_k).reshape(B, N, heads, d_head).transpose(0, 2, 1, 3)
    v = (x @ w_v).reshape(B, N, heads, d_head).transpose(0, 2, 1, 3)
    s = jnp.einsum("bhqd,bhkd->bhqk", q, k) * scale
    p = jax.nn.softmax(s, axis=-1)
    o = jnp.einsum("bhqk,bhkd->bhqd", p, v)
    o = o.transpose(0, 2, 1, 3).reshape(B, N, inner)
    return o @ w_o + b_o


if __name__ == "__main__":
    batch, seq_len, query_dim, heads, dim_head = 2, 8, 32, 4, 8
    inner = heads * dim_head

    key = jax.random.PRNGKey(0)
    kx, kq, kk, kv, ko, kb = jax.random.split(key, 6)
    x = jax.random.normal(kx, (batch, seq_len, query_dim), dtype=jnp.float32)
    # Deterministic synthetic parameters, math layout (in, out).
    w_q = jax.random.normal(kq, (query_dim, inner), dtype=jnp.float32) * 0.05
    w_k = jax.random.normal(kk, (query_dim, inner), dtype=jnp.float32) * 0.05
    w_v = jax.random.normal(kv, (query_dim, inner), dtype=jnp.float32) * 0.05
    w_o = jax.random.normal(ko, (inner, query_dim), dtype=jnp.float32) * 0.05
    b_o = jax.random.normal(kb, (query_dim,), dtype=jnp.float32) * 0.01

    fwd = jax.jit(ldm_self_attn_forward, static_argnames=("heads",))
    out = fwd(x, w_q, w_k, w_v, w_o, b_o, heads=heads)
    out = jax.block_until_ready(out)

    ref = reference_forward(x, w_q, w_k, w_v, w_o, b_o, heads)
    assert out.shape == (batch, seq_len, query_dim)
    max_err = float(jnp.max(jnp.abs(out - ref)))
    # bf16 MXU operands (f32 accumulation / f32 softmax) -> loosened tolerance.
    assert jnp.allclose(out, ref, atol=2e-2, rtol=2e-2), f"mismatch: {max_err}"

    print("KERNEL_OK")
</pallas_src>

<mosaic_0001>
module attributes {stable_mosaic.version = 11 : i64} {
  func.func @_matmul_kernel(%arg0: i32, %arg1: i32, %arg2: i32, %arg3: memref<16x32xf32, #tpu.memory_space<vmem>>, %arg4: memref<32x96xbf16, #tpu.memory_space<vmem>>, %arg5: memref<16x96xbf16, #tpu.memory_space<vmem>>, %arg6: memref<16x96xf32, #tpu.memory_space<vmem>>) attributes {dimension_semantics = [#tpu.dimension_semantics<parallel>, #tpu.dimension_semantics<parallel>, #tpu.dimension_semantics<arbitrary>], iteration_bounds = array<i64: 1, 1, 1>, scalar_prefetch = 0 : i64, scratch_operands = 1 : i64, tpu.core_type = #tpu.core_type<tc>, window_params = [{transform_indices = @transform_0, window_bounds = array<i64: 16, 32>}, {transform_indices = @transform_1, window_bounds = array<i64: 32, 96>}, {transform_indices = @transform_2, window_bounds = array<i64: 16, 96>}]} {
    %c0_i32 = arith.constant 0 : i32
    %0 = arith.cmpi eq, %arg2, %c0_i32 : i32
    %1 = arith.extui %0 : i1 to i32
    %c0_i32_0 = arith.constant 0 : i32
    %2 = arith.cmpi ne, %1, %c0_i32_0 : i32
    scf.if %2 {
      %cst_10 = arith.constant 0.000000e+00 : f32
      %13 = vector.broadcast %cst_10 : f32 to vector<16x96xf32>
      %c0_11 = arith.constant 0 : index
      %c0_12 = arith.constant 0 : index
      %14 = vector.load %arg6[%c0_11, %c0_12] : memref<16x96xf32, #tpu.memory_space<vmem>>, vector<16x96xf32>
      tpu.vector_store %arg6[%c0_11, %c0_12], %13 {strides = array<i32>} : memref<16x96xf32, #tpu.memory_space<vmem>>, vector<16x96xf32>,
    } else {
    }
    %c0 = arith.constant 0 : index
    %c0_1 = arith.constant 0 : index
    %3 = vector.load %arg6[%c0, %c0_1] : memref<16x96xf32, #tpu.memory_space<vmem>>, vector<16x96xf32>
    %c0_2 = arith.constant 0 : index
    %c0_3 = arith.constant 0 : index
    %4 = vector.load %arg3[%c0_2, %c0_3] : memref<16x32xf32, #tpu.memory_space<vmem>>, vector<16x32xf32>
    %5 = arith.truncf %4 : vector<16x32xf32> to vector<16x32xbf16>
    %c0_4 = arith.constant 0 : index
    %c0_5 = arith.constant 0 : index
    %6 = vector.load %arg4[%c0_4, %c0_5] : memref<32x96xbf16, #tpu.memory_space<vmem>>, vector<32x96xbf16>
    %cst = arith.constant dense<0.000000e+00> : vector<16x96xf32>
    %7 = tpu.matmul %5, %6, %cst {dimension_numbers = #tpu.dot_dimension_numbers<[1], [0], [0], [1], [0, 0, 1, 1], [], []>} : vector<16x32xbf16>, vector<32x96xbf16>, vector<16x96xf32> -> vector<16x96xf32>
    %8 = arith.addf %3, %7 : vector<16x96xf32>
    %c0_6 = arith.constant 0 : index
    %c0_7 = arith.constant 0 : index
    %9 = vector.load %arg6[%c0_6, %c0_7] : memref<16x96xf32, #tpu.memory_space<vmem>>, vector<16x96xf32>
    tpu.vector_store %arg6[%c0_6, %c0_7], %8 {strides = array<i32>} : memref<16x96xf32, #tpu.memory_space<vmem>>, vector<16x96xf32>,
    %c0_i32_8 = arith.constant 0 : i32
    %10 = arith.cmpi eq, %arg2, %c0_i32_8 : i32
    %11 = arith.extui %10 : i1 to i32
    %c0_i32_9 = arith.constant 0 : i32
    %12 = arith.cmpi ne, %11, %c0_i32_9 : i32
    scf.if %12 {
      %c0_10 = arith.constant 0 : index
      %c0_11 = arith.constant 0 : index
      %13 = vector.load %arg6[%c0_10, %c0_11] : memref<16x96xf32, #tpu.memory_space<vmem>>, vector<16x96xf32>
      %14 = arith.truncf %13 : vector<16x96xf32> to vector<16x96xbf16>
      %c0_12 = arith.constant 0 : index
      %c0_13 = arith.constant 0 : index
      %15 = vector.load %arg5[%c0_12, %c0_13] : memref<16x96xbf16, #tpu.memory_space<vmem>>, vector<16x96xbf16>
      tpu.vector_store %arg5[%c0_12, %c0_13], %14 {strides = array<i32>} : memref<16x96xbf16, #tpu.memory_space<vmem>>, vector<16x96xbf16>,
    } else {
    }
    return
  }
  func.func @transform_0(%arg0: i32, %arg1: i32, %arg2: i32) -> (i32, i32) {
    %c0_i32 = arith.constant 0 : i32
    return %arg0, %arg2 : i32, i32
  }
  func.func @transform_1(%arg0: i32, %arg1: i32, %arg2: i32) -> (i32, i32) {
    %c0_i32 = arith.constant 0 : i32
    return %arg2, %arg1 : i32, i32
  }
  func.func @transform_2(%arg0: i32, %arg1: i32, %arg2: i32) -> (i32, i32) {
    %c0_i32 = arith.constant 0 : i32
    return %arg0, %arg1 : i32, i32
  }
}

module attributes {stable_mosaic.version = 11 : i64} {
  func.func @_attn_kernel(%arg0: i32, %arg1: i32, %arg2: i32, %arg3: memref<1x1x4x8x8xbf16, #tpu.memory_space<vmem>>, %arg4: memref<1x1x4x8x8xbf16, #tpu.memory_space<vmem>>, %arg5: memref<1x1x4x8x8xbf16, #tpu.memory_space<vmem>>, %arg6: memref<1x8x32xbf16, #tpu.memory_space<vmem>>, %arg7: memref<4x8x1xf32, #tpu.memory_space<vmem>>, %arg8: memref<4x8x1xf32, #tpu.memory_space<vmem>>, %arg9: memref<4x8x8xf32, #tpu.memory_space<vmem>>) attributes {dimension_semantics = [#tpu.dimension_semantics<parallel>, #tpu.dimension_semantics<parallel>, #tpu.dimension_semantics<arbitrary>], iteration_bounds = array<i64: 2, 1, 1>, scalar_prefetch = 0 : i64, scratch_operands = 3 : i64, tpu.core_type = #tpu.core_type<tc>, window_params = [{transform_indices = @transform_0, window_bounds = array<i64: 1, 1, 4, 8, 8>}, {transform_indices = @transform_1, window_bounds = array<i64: 1, 1, 4, 8, 8>}, {transform_indices = @transform_2, window_bounds = array<i64: 1, 1, 4, 8, 8>}, {transform_indices = @transform_3, window_bounds = array<i64: 1, 8, 32>}]} {
    %c0_i32 = arith.constant 0 : i32
    %0 = arith.cmpi eq, %arg2, %c0_i32 : i32
    %1 = arith.extui %0 : i1 to i32
    %c0_i32_0 = arith.constant 0 : i32
    %2 = arith.cmpi ne, %1, %c0_i32_0 : i32
    scf.if %2 {
      %cst_38 = arith.constant 0xFF800000 : f32
      %36 = vector.broadcast %cst_38 : f32 to vector<4x8x1xf32>
      %c0_39 = arith.constant 0 : index
      %c0_40 = arith.constant 0 : index
      %c0_41 = arith.constant 0 : index
      %37 = vector.load %arg7[%c0_39, %c0_40, %c0_41] : memref<4x8x1xf32, #tpu.memory_space<vmem>>, vector<4x8x1xf32>
      tpu.vector_store %arg7[%c0_39, %c0_40, %c0_41], %36 {strides = array<i32>} : memref<4x8x1xf32, #tpu.memory_space<vmem>>, vector<4x8x1xf32>,
      %cst_42 = arith.constant 0.000000e+00 : f32
      %38 = vector.broadcast %cst_42 : f32 to vector<4x8x1xf32>
      %c0_43 = arith.constant 0 : index
      %c0_44 = arith.constant 0 : index
      %c0_45 = arith.constant 0 : index
      %39 = vector.load %arg8[%c0_43, %c0_44, %c0_45] : memref<4x8x1xf32, #tpu.memory_space<vmem>>, vector<4x8x1xf32>
      tpu.vector_store %arg8[%c0_43, %c0_44, %c0_45], %38 {strides = array<i32>} : memref<4x8x1xf32, #tpu.memory_space<vmem>>, vector<4x8x1xf32>,
      %cst_46 = arith.constant 0.000000e+00 : f32
      %40 = vector.broadcast %cst_46 : f32 to vector<4x8x8xf32>
      %c0_47 = arith.constant 0 : index
      %c0_48 = arith.constant 0 : index
      %c0_49 = arith.constant 0 : index
      %41 = vector.load %arg9[%c0_47, %c0_48, %c0_49] : memref<4x8x8xf32, #tpu.memory_space<vmem>>, vector<4x8x8xf32>
      tpu.vector_store %arg9[%c0_47, %c0_48, %c0_49], %40 {strides = array<i32>} : memref<4x8x8xf32, #tpu.memory_space<vmem>>, vector<4x8x8xf32>,
    } else {
    }
    %c0 = arith.constant 0 : index
    %c0_1 = arith.constant 0 : index
    %c0_2 = arith.constant 0 : index
    %c0_3 = arith.constant 0 : index
    %c0_4 = arith.constant 0 : index
    %3 = vector.load %arg3[%c0, %c0_1, %c0_2, %c0_3, %c0_4] : memref<1x1x4x8x8xbf16, #tpu.memory_space<vmem>>, vector<1x1x4x8x8xbf16>
    %4 = vector.shape_cast %3 : vector<1x1x4x8x8xbf16> to vector<4x8x8xbf16>
    %c0_5 = arith.constant 0 : index
    %c0_6 = arith.constant 0 : index
    %c0_7 = arith.constant 0 : index
    %c0_8 = arith.constant 0 : index
    %c0_9 = arith.constant 0 : index
    %5 = vector.load %arg4[%c0_5, %c0_6, %c0_7, %c0_8, %c0_9] : memref<1x1x4x8x8xbf16, #tpu.memory_space<vmem>>, vector<1x1x4x8x8xbf16>
    %6 = vector.shape_cast %5 : vector<1x1x4x8x8xbf16> to vector<4x8x8xbf16>
    %cst = arith.constant dense<0.000000e+00> : vector<4x8x8xf32>
    %7 = tpu.matmul %4, %6, %cst {dimension_numbers = #tpu.dot_dimension_numbers<[2], [2], [1], [1], [0, 0, 0, 1, 1, 1], [0], [0]>} : vector<4x8x8xbf16>, vector<4x8x8xbf16>, vector<4x8x8xf32> -> vector<4x8x8xf32>
    %c0_10 = arith.constant 0 : index
    %c0_11 = arith.constant 0 : index
    %c0_12 = arith.constant 0 : index
    %8 = vector.load %arg7[%c0_10, %c0_11, %c0_12] : memref<4x8x1xf32, #tpu.memory_space<vmem>>, vector<4x8x1xf32>
    %cst_13 = arith.constant dense<0xFF800000> : vector<4x8xf32>
    %9 = vector.multi_reduction <maximumf>, %7, %cst_13 [2] : vector<4x8x8xf32> to vector<4x8xf32>
    %10 = vector.shape_cast %9 : vector<4x8xf32> to vector<4x8x1xf32>
    %11 = arith.maximumf %8, %10 : vector<4x8x1xf32>
    %12 = arith.subf %8, %11 : vector<4x8x1xf32>
    %13 = math.exp %12 : vector<4x8x1xf32>
    %14 = vector.broadcast %11 : vector<4x8x1xf32> to vector<4x8x8xf32>
    %15 = arith.subf %7, %14 : vector<4x8x8xf32>
    %16 = math.exp %15 : vector<4x8x8xf32>
    %c0_14 = arith.constant 0 : index
    %c0_15 = arith.constant 0 : index
    %c0_16 = arith.constant 0 : index
    %17 = vector.load %arg8[%c0_14, %c0_15, %c0_16] : memref<4x8x1xf32, #tpu.memory_space<vmem>>, vector<4x8x1xf32>
    %18 = arith.mulf %13, %17 : vector<4x8x1xf32>
    %cst_17 = arith.constant dense<0.000000e+00> : vector<4x8xf32>
    %19 = vector.multi_reduction <add>, %16, %cst_17 [2] : vector<4x8x8xf32> to vector<4x8xf32>
    %20 = vector.shape_cast %19 : vector<4x8xf32> to vector<4x8x1xf32>
    %21 = arith.addf %18, %20 : vector<4x8x1xf32>
    %c0_18 = arith.constant 0 : index
    %c0_19 = arith.constant 0 : index
    %c0_20 = arith.constant 0 : index
    %22 = vector.load %arg8[%c0_18, %c0_19, %c0_20] : memref<4x8x1xf32, #tpu.memory_space<vmem>>, vector<4x8x1xf32>
    tpu.vector_store %arg8[%c0_18, %c0_19, %c0_20], %21 {strides = array<i32>} : memref<4x8x1xf32, #tpu.memory_space<vmem>>, vector<4x8x1xf32>,
    %23 = arith.truncf %16 : vector<4x8x8xf32> to vector<4x8x8xbf16>
    %c0_21 = arith.constant 0 : index
    %c0_22 = arith.constant 0 : index
    %c0_23 = arith.constant 0 : index
    %c0_24 = arith.constant 0 : index
    %c0_25 = arith.constant 0 : index
    %24 = vector.load %arg5[%c0_21, %c0_22, %c0_23, %c0_24, %c0_25] : memref<1x1x4x8x8xbf16, #tpu.memory_space<vmem>>, vector<1x1x4x8x8xbf16>
    %25 = vector.shape_cast %24 : vector<1x1x4x8x8xbf16> to vector<4x8x8xbf16>
    %cst_26 = arith.constant dense<0.000000e+00> : vector<4x8x8xf32>
    %26 = tpu.matmul %23, %25, %cst_26 {dimension_numbers = #tpu.dot_dimension_numbers<[2], [1], [1], [2], [0, 0, 0, 1, 1, 2], [0], [0]>} : vector<4x8x8xbf16>, vector<4x8x8xbf16>, vector<4x8x8xf32> -> vector<4x8x8xf32>
    %c0_27 = arith.constant 0 : index
    %c0_28 = arith.constant 0 : index
    %c0_29 = arith.constant 0 : index
    %27 = vector.load %arg9[%c0_27, %c0_28, %c0_29] : memref<4x8x8xf32, #tpu.memory_space<vmem>>, vector<4x8x8xf32>
    %28 = vector.broadcast %13 : vector<4x8x1xf32> to vector<4x8x8xf32>
    %29 = arith.mulf %28, %27 : vector<4x8x8xf32>
    %30 = arith.addf %29, %26 : vector<4x8x8xf32>
    %c0_30 = arith.constant 0 : index
    %c0_31 = arith.constant 0 : index
    %c0_32 = arith.constant 0 : index
    %31 = vector.load %arg9[%c0_30, %c0_31, %c0_32] : memref<4x8x8xf32, #tpu.memory_space<vmem>>, vector<4x8x8xf32>
    tpu.vector_store %arg9[%c0_30, %c0_31, %c0_32], %30 {strides = array<i32>} : memref<4x8x8xf32, #tpu.memory_space<vmem>>, vector<4x8x8xf32>,
    %c0_33 = arith.constant 0 : index
    %c0_34 = arith.constant 0 : index
    %c0_35 = arith.constant 0 : index
    %32 = vector.load %arg7[%c0_33, %c0_34, %c0_35] : memref<4x8x1xf32, #tpu.memory_space<vmem>>, vector<4x8x1xf32>
    tpu.vector_store %arg7[%c0_33, %c0_34, %c0_35], %11 {strides = array<i32>} : memref<4x8x1xf32, #tpu.memory_space<vmem>>, vector<4x8x1xf32>,
    %c0_i32_36 = arith.constant 0 : i32
    %33 = arith.cmpi eq, %arg2, %c0_i32_36 : i32
    %34 = arith.extui %33 : i1 to i32
    %c0_i32_37 = arith.constant 0 : i32
    %35 = arith.cmpi ne, %34, %c0_i32_37 : i32
    scf.if %35 {
      %c0_38 = arith.constant 0 : index
      %c0_39 = arith.constant 0 : index
      %c0_40 = arith.constant 0 : index
      %36 = vector.load %arg8[%c0_38, %c0_39, %c0_40] : memref<4x8x1xf32, #tpu.memory_space<vmem>>, vector<4x8x1xf32>
      %37 = tpu.reciprocal %36 {approx = true} : vector<4x8x1xf32> -> vector<4x8x1xf32>
      %c0_41 = arith.constant 0 : index
      %c0_42 = arith.constant 0 : index
      %c0_43 = arith.constant 0 : index
      %38 = vector.load %arg9[%c0_41, %c0_42, %c0_43] : memref<4x8x8xf32, #tpu.memory_space<vmem>>, vector<4x8x8xf32>
      %39 = vector.broadcast %37 : vector<4x8x1xf32> to vector<4x8x8xf32>
      %40 = arith.mulf %38, %39 : vector<4x8x8xf32>
      %41 = vector.extract_strided_slice %40 {offsets = [0, 0, 0], sizes = [1, 8, 8], strides = [1, 1, 1]} : vector<4x8x8xf32> to vector<1x8x8xf32>
      %42 = vector.shape_cast %41 : vector<1x8x8xf32> to vector<8x8xf32>
      %43 = arith.truncf %42 : vector<8x8xf32> to vector<8x8xbf16>
      %c0_44 = arith.constant 0 : index
      %c0_45 = arith.constant 0 : index
      %c0_46 = arith.constant 0 : index
      %44 = vector.load %arg6[%c0_44, %c0_45, %c0_46] : memref<1x8x32xbf16, #tpu.memory_space<vmem>>, vector<1x8x8xbf16>
      %45 = vector.shape_cast %44 : vector<1x8x8xbf16> to vector<8x8xbf16>
      %46 = vector.shape_cast %43 : vector<8x8xbf16> to vector<1x8x8xbf16>
      tpu.vector_store %arg6[%c0_44, %c0_45, %c0_46], %46 {strides = array<i32>} : memref<1x8x32xbf16, #tpu.memory_space<vmem>>, vector<1x8x8xbf16>,
      %47 = vector.extract_strided_slice %40 {offsets = [1, 0, 0], sizes = [1, 8, 8], strides = [1, 1, 1]} : vector<4x8x8xf32> to vector<1x8x8xf32>
      %48 = vector.shape_cast %47 : vector<1x8x8xf32> to vector<8x8xf32>
      %49 = arith.truncf %48 : vector<8x8xf32> to vector<8x8xbf16>
      %c0_47 = arith.constant 0 : index
      %c0_48 = arith.constant 0 : index
      %c8 = arith.constant 8 : index
      %50 = vector.load %arg6[%c0_47, %c0_48, %c8] : memref<1x8x32xbf16, #tpu.memory_space<vmem>>, vector<1x8x8xbf16>
      %51 = vector.shape_cast %50 : vector<1x8x8xbf16> to vector<8x8xbf16>
      %52 = vector.shape_cast %49 : vector<8x8xbf16> to vector<1x8x8xbf16>
      tpu.vector_store %arg6[%c0_47, %c0_48, %c8], %52 {strides = array<i32>} : memref<1x8x32xbf16, #tpu.memory_space<vmem>>, vector<1x8x8xbf16>,
      %53 = vector.extract_strided_slice %40 {offsets = [2, 0, 0], sizes = [1, 8, 8], strides = [1, 1, 1]} : vector<4x8x8xf32> to vector<1x8x8xf32>
      %54 = vector.shape_cast %53 : vector<1x8x8xf32> to vector<8x8xf32>
      %55 = arith.truncf %54 : vector<8x8xf32> to vector<8x8xbf16>
      %c0_49 = arith.constant 0 : index
      %c0_50 = arith.constant 0 : index
      %c16 = arith.constant 16 : index
      %56 = vector.load %arg6[%c0_49, %c0_50, %c16] : memref<1x8x32xbf16, #tpu.memory_space<vmem>>, vector<1x8x8xbf16>
      %57 = vector.shape_cast %56 : vector<1x8x8xbf16> to vector<8x8xbf16>
      %58 = vector.shape_cast %55 : vector<8x8xbf16> to vector<1x8x8xbf16>
      tpu.vector_store %arg6[%c0_49, %c0_50, %c16], %58 {strides = array<i32>} : memref<1x8x32xbf16, #tpu.memory_space<vmem>>, vector<1x8x8xbf16>,
      %59 = vector.extract_strided_slice %40 {offsets = [3, 0, 0], sizes = [1, 8, 8], strides = [1, 1, 1]} : vector<4x8x8xf32> to vector<1x8x8xf32>
      %60 = vector.shape_cast %59 : vector<1x8x8xf32> to vector<8x8xf32>
      %61 = arith.truncf %60 : vector<8x8xf32> to vector<8x8xbf16>
      %c0_51 = arith.constant 0 : index
      %c0_52 = arith.constant 0 : index
      %c24 = arith.constant 24 : index
      %62 = vector.load %arg6[%c0_51, %c0_52, %c24] : memref<1x8x32xbf16, #tpu.memory_space<vmem>>, vector<1x8x8xbf16>
      %63 = vector.shape_cast %62 : vector<1x8x8xbf16> to vector<8x8xbf16>
      %64 = vector.shape_cast %61 : vector<8x8xbf16> to vector<1x8x8xbf16>
      tpu.vector_store %arg6[%c0_51, %c0_52, %c24], %64 {strides = array<i32>} : memref<1x8x32xbf16, #tpu.memory_space<vmem>>, vector<1x8x8xbf16>,
    } else {
    }
    return
  }
  func.func @transform_0(%arg0: i32, %arg1: i32, %arg2: i32) -> (i32, i32, i32, i32, i32) {
    %c0_i32 = arith.constant 0 : i32
    %c0_i32_0 = arith.constant 0 : i32
    %c0_i32_1 = arith.constant 0 : i32
    %c0_i32_2 = arith.constant 0 : i32
    return %arg0, %c0_i32, %c0_i32_0, %arg1, %c0_i32_1 : i32, i32, i32, i32, i32
  }
  func.func @transform_1(%arg0: i32, %arg1: i32, %arg2: i32) -> (i32, i32, i32, i32, i32) {
    %c1_i32 = arith.constant 1 : i32
    %c0_i32 = arith.constant 0 : i32
    %c0_i32_0 = arith.constant 0 : i32
    %c0_i32_1 = arith.constant 0 : i32
    return %arg0, %c1_i32, %c0_i32, %arg2, %c0_i32_0 : i32, i32, i32, i32, i32
  }
  func.func @transform_2(%arg0: i32, %arg1: i32, %arg2: i32) -> (i32, i32, i32, i32, i32) {
    %c2_i32 = arith.constant 2 : i32
    %c0_i32 = arith.constant 0 : i32
    %c0_i32_0 = arith.constant 0 : i32
    %c0_i32_1 = arith.constant 0 : i32
    return %arg0, %c2_i32, %c0_i32, %arg2, %c0_i32_0 : i32, i32, i32, i32, i32
  }
  func.func @transform_3(%arg0: i32, %arg1: i32, %arg2: i32) -> (i32, i32, i32) {
    %c0_i32 = arith.constant 0 : i32
    %c0_i32_0 = arith.constant 0 : i32
    return %arg0, %arg1, %c0_i32 : i32, i32, i32
  }
}

module attributes {stable_mosaic.version = 11 : i64} {
  func.func @_matmul_bias_kernel(%arg0: i32, %arg1: i32, %arg2: i32, %arg3: memref<16x32xbf16, #tpu.memory_space<vmem>>, %arg4: memref<32x32xbf16, #tpu.memory_space<vmem>>, %arg5: memref<1x32xf32, #tpu.memory_space<vmem>>, %arg6: memref<16x32xf32, #tpu.memory_space<vmem>>, %arg7: memref<16x32xf32, #tpu.memory_space<vmem>>) attributes {dimension_semantics = [#tpu.dimension_semantics<parallel>, #tpu.dimension_semantics<parallel>, #tpu.dimension_semantics<arbitrary>], iteration_bounds = array<i64: 1, 1, 1>, scalar_prefetch = 0 : i64, scratch_operands = 1 : i64, tpu.core_type = #tpu.core_type<tc>, window_params = [{transform_indices = @transform_0, window_bounds = array<i64: 16, 32>}, {transform_indices = @transform_1, window_bounds = array<i64: 32, 32>}, {transform_indices = @transform_2, window_bounds = array<i64: 1, 32>}, {transform_indices = @transform_3, window_bounds = array<i64: 16, 32>}]} {
    %c0_i32 = arith.constant 0 : i32
    %0 = arith.cmpi eq, %arg2, %c0_i32 : i32
    %1 = arith.extui %0 : i1 to i32
    %c0_i32_0 = arith.constant 0 : i32
    %2 = arith.cmpi ne, %1, %c0_i32_0 : i32
    scf.if %2 {
      %cst_10 = arith.constant 0.000000e+00 : f32
      %12 = vector.broadcast %cst_10 : f32 to vector<16x32xf32>
      %c0_11 = arith.constant 0 : index
      %c0_12 = arith.constant 0 : index
      %13 = vector.load %arg7[%c0_11, %c0_12] : memref<16x32xf32, #tpu.memory_space<vmem>>, vector<16x32xf32>
      tpu.vector_store %arg7[%c0_11, %c0_12], %12 {strides = array<i32>} : memref<16x32xf32, #tpu.memory_space<vmem>>, vector<16x32xf32>,
    } else {
    }
    %c0 = arith.constant 0 : index
    %c0_1 = arith.constant 0 : index
    %3 = vector.load %arg7[%c0, %c0_1] : memref<16x32xf32, #tpu.memory_space<vmem>>, vector<16x32xf32>
    %c0_2 = arith.constant 0 : index
    %c0_3 = arith.constant 0 : index
    %4 = vector.load %arg3[%c0_2, %c0_3] : memref<16x32xbf16, #tpu.memory_space<vmem>>, vector<16x32xbf16>
    %c0_4 = arith.constant 0 : index
    %c0_5 = arith.constant 0 : index
    %5 = vector.load %arg4[%c0_4, %c0_5] : memref<32x32xbf16, #tpu.memory_space<vmem>>, vector<32x32xbf16>
    %cst = arith.constant dense<0.000000e+00> : vector<16x32xf32>
    %6 = tpu.matmul %4, %5, %cst {dimension_numbers = #tpu.dot_dimension_numbers<[1], [0], [0], [1], [0, 0, 1, 1], [], []>} : vector<16x32xbf16>, vector<32x32xbf16>, vector<16x32xf32> -> vector<16x32xf32>
    %7 = arith.addf %3, %6 : vector<16x32xf32>
    %c0_6 = arith.constant 0 : index
    %c0_7 = arith.constant 0 : index
    %8 = vector.load %arg7[%c0_6, %c0_7] : memref<16x32xf32, #tpu.memory_space<vmem>>, vector<16x32xf32>
    tpu.vector_store %arg7[%c0_6, %c0_7], %7 {strides = array<i32>} : memref<16x32xf32, #tpu.memory_space<vmem>>, vector<16x32xf32>,
    %c0_i32_8 = arith.constant 0 : i32
    %9 = arith.cmpi eq, %arg2, %c0_i32_8 : i32
    %10 = arith.extui %9 : i1 to i32
    %c0_i32_9 = arith.constant 0 : i32
    %11 = arith.cmpi ne, %10, %c0_i32_9 : i32
    scf.if %11 {
      %c0_10 = arith.constant 0 : index
      %c0_11 = arith.constant 0 : index
      %12 = vector.load %arg7[%c0_10, %c0_11] : memref<16x32xf32, #tpu.memory_space<vmem>>, vector<16x32xf32>
      %c0_12 = arith.constant 0 : index
      %c0_13 = arith.constant 0 : index
      %13 = vector.load %arg5[%c0_12, %c0_13] : memref<1x32xf32, #tpu.memory_space<vmem>>, vector<1x32xf32>
      %14 = vector.broadcast %13 : vector<1x32xf32> to vector<16x32xf32>
      %15 = arith.addf %12, %14 : vector<16x32xf32>
      %c0_14 = arith.constant 0 : index
      %c0_15 = arith.constant 0 : index
      %16 = vector.load %arg6[%c0_14, %c0_15] : memref<16x32xf32, #tpu.memory_space<vmem>>, vector<16x32xf32>
      tpu.vector_store %arg6[%c0_14, %c0_15], %15 {strides = array<i32>} : memref<16x32xf32, #tpu.memory_space<vmem>>, vector<16x32xf32>,
    } else {
    }
    return
  }
  func.func @transform_0(%arg0: i32, %arg1: i32, %arg2: i32) -> (i32, i32) {
    %c0_i32 = arith.constant 0 : i32
    return %arg0, %arg2 : i32, i32
  }
  func.func @transform_1(%arg0: i32, %arg1: i32, %arg2: i32) -> (i32, i32) {
    %c0_i32 = arith.constant 0 : i32
    return %arg2, %arg1 : i32, i32
  }
  func.func @transform_2(%arg0: i32, %arg1: i32, %arg2: i32) -> (i32, i32) {
    %c0_i32 = arith.constant 0 : i32
    %c0_i32_0 = arith.constant 0 : i32
    return %c0_i32, %arg1 : i32, i32
  }
  func.func @transform_3(%arg0: i32, %arg1: i32, %arg2: i32) -> (i32, i32) {
    %c0_i32 = arith.constant 0 : i32
    return %arg0, %arg1 : i32, i32
  }
}

</mosaic_0001>

<bundles_post_ra>
// kernel: ldm_self_attn_forward.3
= control target key start
LH: loop header
LB: loop body
LE: loop exit
PB: predicated region body
PF: predicated region fallthrough
CT: control target
= control target key end

     0   :  { %vm16_vm0 = vcmask 785408   ;;  %v132_v0 = vmov 0.0   ;;  %vm133_vm1 = vmmov 0   ;;  %vm40_vm2 = vcmask 261120   ;;  %s171_s1 = inlined_call_operand.vmem [shape: bf16[32,96], index: 1, kind: input, shape index: {}]   ;;  %s172_s0 = inlined_call_operand.vmem [shape: f32[16,32], index: 0, kind: input, shape index: {}]   ;;  %s173_s2 = inlined_call_operand.vmem [shape: bf16[16,96], index: 2, kind: output, shape index: {}]  }
   0x1   :  { %120 = vmatprep.subr.bf16.mxu0 %v132_v0  ;;  %v130_v1 = vld [vmem:[%s171_s1] sm:$0xff]   ;;  %124 = vmatprep.mubr.msk.bf16.mxu0 %vm133_vm1, %v132_v0  ;;  %17 = vst.msk [vmem:[#allocation2] sm:$0xff] %vm16_vm0, %v132_v0  ;;  %18 = vst.msk [vmem:[#allocation2 + $0x8] sm:$0xff] %vm16_vm0, %v132_v0  ;;  %v131_v2 = vld [vmem:[%s171_s1 + $0x8] sm:$0xff]   ;;  %vm103_vm3 = vcmask 781312  }
   0x2   :  { %121 = vmatpush3.bf16.msra.mxu0 %v130_v1  ;;  %v21_v3 = vld [vmem:[%s172_s0] sm:$0xff]  ;;  %v22_v4 = vld [vmem:[%s172_s0 + $0x8] sm:$0xff] }
   0x3   :  { %122 = vmatprep.subr.bf16.mxu0 %v132_v0  ;;  %v23_v5 = vpack.c.bf16 %v22_v4, %v21_v3 }
   0x6   :  { %123 = vmatpush3.bf16.msra.mxu0 %v131_v2 }
   0x8   :  { %v19_v6 = vld [vmem:[#allocation2] sm:$0xff]  ;;  %v20_v8 = vld [vmem:[#allocation2 + $0x8] sm:$0xff] }
   0x9   :  { %125 = vmatmul.mubr.msk.bf16.vlgmr.msra.gmra.mrb[0].mxu0 %vm40_vm2, %v23_v5 }
  0xdc   :  { %v78_v7 = vpop.f32.mrb[0].mxu0 }
  0xdd   :  { %v85_v9 = vadd.f32 %v78_v7, %v19_v6  ;;  %v126_v10 = vpop.f32.mrb[1].mxu0 }
  0xde   :  { %v81_v11 = vpop.f32.mrb[2].mxu0 }
  0xdf   :  { %88 = vst.msk [vmem:[#allocation2] sm:$0xff] %vm16_vm0, %v85_v9  ;;  %v86_v12 = vadd.f32 %v81_v11, %v20_v8  ;;  %v127_v13 = vpop.f32.mrb[3].mxu0 }
  0xe1   :  { %89 = vst.msk [vmem:[#allocation2 + $0x8] sm:$0xff] %vm16_vm0, %v86_v12 }
  0xe6   :  { %v93_v14 = vld [vmem:[#allocation2] sm:$0xff] }
  0xe7   :  { %v115_v15 = vpack.c.bf16 %v93_v14, %v93_v14 }
  0xe8   :  { %v94_v16 = vld [vmem:[#allocation2 + $0x8] sm:$0xff] }
  0xe9   :  { %104 = vst.msk [vmem:[%s173_s2] sm:$0xf] %vm103_vm3, %v115_v15  ;;  %v116_v17 = vpack.c.bf16 %v94_v16, %v94_v16 }
  0xeb   :  { %105 = vst.msk [vmem:[%s173_s2 + $0x4] sm:$0xf] %vm103_vm3, %v116_v17 }

// kernel: ldm_self_attn_forward.5
= control target key start
LH: loop header
LB: loop body
LE: loop exit
PB: predicated region body
PF: predicated region fallthrough
CT: control target
= control target key end

     0   :  { %v177_v1 = vmov 0.0   ;;  %vm178_vm0 = vmmov 0   ;;  %vm20_vm1 = vcmask 261120   ;;  %s233_s0 = inlined_call_operand.vmem [shape: bf16[16,32], index: 0, kind: input, shape index: {}]   ;;  %s234_s1 = inlined_call_operand.vmem [shape: bf16[32,32], index: 1, kind: input, shape index: {}]   ;;  %s235_s2 = inlined_call_operand.vmem [shape: f32[1,32], index: 2, kind: input, shape index: {}]   ;;  %s236_s3 = inlined_call_operand.hbm [shape: f32[16,32], index: 3, kind: output, shape index: {}]  }
   0x1   :  { %v150_v0 = vld [vmem:[%s234_s1] sm:$0xff]   ;;  %137 = vmatprep.subr.bf16.mxu0 %v177_v1  ;;  %v151_v2 = vld [vmem:[%s234_s1 + $0x8] sm:$0xff]   ;;  %141 = vmatprep.mubr.msk.bf16.mxu0 %vm178_vm0, %v177_v1  ;;  %21 = vst.msk [vmem:[#allocation2] sm:$0xff] %vm20_vm1, %v177_v1  ;;  %22 = vst.msk [vmem:[#allocation2 + $0x8] sm:$0xff] %vm20_vm1, %v177_v1 }
   0x2   :  { %138 = vmatpush3.bf16.msra.mxu0 %v150_v0 }
   0x3   :  { %139 = vmatprep.subr.bf16.mxu0 %v177_v1 }
   0x4   :  { %8 = vsyncpa [#allocation4], 0  ;;  %v152_v3 = vld [vmem:[%s233_s0] sm:$0xff]   ;;  %s179_s0 = smov [#allocation3]  }
   0x5   :  { %v133_v12 = vld [vmem:[%s235_s2] ss:$0 sm:$0xff]  ;;  %s118_s19 = sshll.u32 %s179_s0, 4  ;;  %s119_s19 = int_to_ptr.vmem [resolvable:$true] %s118_s19 }
   0x6   :  { %140 = vmatpush3.bf16.msra.mxu0 %v151_v2  ;;  %s153_s20 = scalar_lea.vmem %s119_s19, 256  ;;  %p158_p1 = scmp.lt.s32.totalorder %s119_s19, %s119_s19 }
   0x7   :  { %p154_p0 = scmp.ne.s32.totalorder %s119_s19, %s153_s20  ;;  %p159_p2 = scmp.lt.s32.totalorder %s153_s20, %s153_s20 }
   0x8   :  { %v23_v4 = vld [vmem:[#allocation2] sm:$0xff]  ;;  %v24_v6 = vld [vmem:[#allocation2 + $0x8] sm:$0xff] }
   0x9   :  { %142 = vmatmul.mubr.msk.bf16.vlgmr.msra.gmra.mrb[0].mxu0 %vm20_vm1, %v152_v3  ;;  %p160_p3 = por %p159_p2, %p158_p1 }
   0xb   :  { %p161_p4 = pnand %p160_p3, %p154_p0 }
  0xdc   :  { %v86_v5 = vpop.f32.mrb[0].mxu0 }
  0xdd   :  { %v93_v7 = vadd.f32 %v86_v5, %v23_v4  ;;  %v143_v8 = vpop.f32.mrb[1].mxu0 }
  0xde   :  { %v89_v9 = vpop.f32.mrb[2].mxu0 }
  0xdf   :  { %95 = vst.msk [vmem:[#allocation2] sm:$0xff] %vm20_vm1, %v93_v7  ;;  %v94_v10 = vadd.f32 %v89_v9, %v24_v6  ;;  %v144_v11 = vpop.f32.mrb[3].mxu0 }
  0xe1   :  { %96 = vst.msk [vmem:[#allocation2 + $0x8] sm:$0xff] %vm20_vm1, %v94_v10 }
  0xe6   :  { %v100_v13 = vld [vmem:[#allocation2] sm:$0xff] }
  0xe7   :  { %v109_v14 = vadd.f32 %v133_v12, %v100_v13 }
  0xe8   :  { %v101_v15 = vld [vmem:[#allocation2 + $0x8] sm:$0xff] }
  0xe9   :  { %v110_v16 = vadd.f32 %v133_v12, %v101_v15  ;;  %111 = vst.msk [vmem:[#allocation3] sm:$0xff] %vm20_vm1, %v109_v14 }
  0xeb   :  { %112 = vst.msk [vmem:[#allocation3 + $0x8] sm:$0xff] %vm20_vm1, %v110_v16 }
  0xec   :  { %164 = shalt.err (!%p161_p4)
}
  0xed   :  { %s165_s22 = scalar_lea.hbm %s236_s3, 256 }
  0xee   :  { %p166_p5 = scmp.ne.s32.totalorder %s236_s3, %s165_s22  ;;  %p169_p6 = scmp.lt.u32.totalorder %s165_s22, %s236_s3 }
  0xf0   :  { %p171_p7 = pnand %p169_p6, %p166_p5 }
  0xf2   :  { %174 = shalt.err (!%p171_p7)
}
  0xf3   :  { %s180_s27 = smov 128   ;;  %s181_s28 = smov 8  }
  0xf4   :  { %124 = dma.vmem_to_hbm [thread:$0]  %s119_s19, 256, %s236_s3, [#allocation4], %s180_s27, %s180_s27, %s181_s28  }
  0xf5   :  { %175 = dma.done.wait [#allocation4], 256  }
  0xf6   :  { %176 = vsyncadd [#allocation4], 4294967040 }
  0xf7   :  { %128 = vsyncpa [#allocation4], 1 }

// kernel: ldm_self_attn_forward.4
= control target key start
LH: loop header
LB: loop body
LE: loop exit
PB: predicated region body
PF: predicated region fallthrough
CT: control target
= control target key end

     0   :  { %s1210_s12 = smov 0   ;;  %s1212_s13 = smov 0   ;;  %s1382_s0 = inlined_call_operand.vmem [shape: bf16[2,3,4,8,8], index: 0, kind: input, shape index: {}, may-alias: {0,1,2}]   ;;  %s1383_s1 = inlined_call_operand.vmem [shape: bf16[2,3,4,8,8], index: 1, kind: input, shape index: {}, may-alias: {0,1,2}]   ;;  %s1384_s2 = inlined_call_operand.vmem [shape: bf16[2,3,4,8,8], index: 2, kind: input, shape index: {}, may-alias: {0,1,2}]   ;;  %s1385_s3 = inlined_call_operand.vmem [shape: bf16[2,8,32], index: 3, kind: output, shape index: {}]  }
   0x1   :  { %s1214_s14 = smov 0  }
   0x2 LB: > { %s32_s15 = sadd.s32 1, %s1177_s13  ;;  %p1008_p0 = scmp.ge.s32.totalorder %s1181_s14, 1  ;;  %s1181_s14 = sphi %s1214_s14, %s13_s14   ;;  %s1177_s13 = sphi %s1212_s13, %s1387_s13   ;;  %s1173_s12 = sphi %s1210_s12, %s1386_s12  }
   0x3   : > { %p34_p1 = scmp.ge.s32.totalorder %s32_s15, 2  ;;  %p195_p2 = scmp.lt.s32.totalorder %s1181_s14, 3 }
   0x5   : > { %s1389_s15 = smov (%p34_p1, %s32_s15), 0  ;;  %p196_p3 = pnand %p1008_p0, %p195_p2 }
   0x6   : > { %p242_p4 = scmp.lt.s32.totalorder (!%p196_p3), %s1173_s12, 1  ;;  %vm289_vm0 = vcmask (!%p196_p3), 64512   ;;  %v1183_v0 = vmov (!%p196_p3), 0.0   ;;  %vm1184_vm1 = vmmov (!%p196_p3), 0   ;;  %vm280_vm2 = vcmask (!%p196_p3), 7168   ;;  %s1187_s26 = smov (!%p196_p3), 8  }
   0x7   : > { %199 = sbr.rel (%p196_p3) target bundleno = 951 (0x3b7), region = 32  ;;  %1053 = vmatprep.subr.bf16.mxu0 (!%p196_p3), %v1183_v0  ;;  %290 = vst.msk [vmem:[#allocation4] sm:$0xff] (!%p196_p3), %vm289_vm0, %v1183_v0  ;;  %291 = vst.msk [vmem:[#allocation4 + $0x8] sm:$0xff] (!%p196_p3), %vm289_vm0, %v1183_v0  ;;  %1059 = vmatprep.subr.bf16.mxu1 (!%p196_p3), %v1183_v0  ;;  %v1185_v13 = vmov (!%p196_p3), -inf   ;;  %v1186_v34 = vmov (!%p196_p3), 0   ;;  %vm591_vm3 = vcmask (!%p196_p3), 1043456  }
   0x8   : > { %292 = vst.msk [vmem:[#allocation4 + $0x10] sm:$0xff] (!%p196_p3), %vm289_vm0, %v1183_v0  ;;  %293 = vst.msk [vmem:[#allocation4 + $0x18] sm:$0xff] (!%p196_p3), %vm289_vm0, %v1183_v0  ;;  %1055 = vmatprep.mubr.msk.bf16.mxu0 (!%p196_p3), %vm1184_vm1, %v1183_v0  ;;  %1061 = vmatprep.mubr.msk.bf16.mxu1 (!%p196_p3), %vm1184_vm1, %v1183_v0  ;;  %s1188_s27 = smov (!%p196_p3), 16   ;;  %s1189_s28 = smov (!%p196_p3), 24   ;;  %vm853_vm4 = vcmask (!%p196_p3), 60416   ;;  %vm862_vm5 = vcmask (!%p196_p3), 126016  }
   0x9   : > { %281 = vst.msk [vmem:[#allocation2] sm:$0xff] (!%p196_p3), %vm280_vm2, %v1185_v13  ;;  %282 = vst.msk [vmem:[#allocation2 + $0x8] sm:$0xff] (!%p196_p3), %vm280_vm2, %v1185_v13  ;;  %1133 = vset.pattern.permute.xlu0 (!%p196_p3), %v1186_v34  ;;  %1134 = vset.pattern.permute.xlu1 (!%p196_p3), %v1186_v34  ;;  %vm871_vm6 = vcmask (!%p196_p3), 191616   ;;  %vm880_vm7 = vcmask (!%p196_p3), 257216  }
   0xa   : > { %283 = vst.msk [vmem:[#allocation2 + $0x10] sm:$0xff] (!%p196_p3), %vm280_vm2, %v1185_v13  ;;  %284 = vst.msk [vmem:[#allocation2 + $0x18] sm:$0xff] (!%p196_p3), %vm280_vm2, %v1185_v13 }
   0xb   : > { %285 = vst.msk [vmem:[#allocation3] sm:$0xff] (!%p196_p3), %vm280_vm2, %v1183_v0  ;;  %286 = vst.msk [vmem:[#allocation3 + $0x8] sm:$0xff] (!%p196_p3), %vm280_vm2, %v1183_v0 }
   0xc   : > { %287 = vst.msk [vmem:[#allocation3 + $0x10] sm:$0xff] (!%p196_p3), %vm280_vm2, %v1183_v0  ;;  %288 = vst.msk [vmem:[#allocation3 + $0x18] sm:$0xff] (!%p196_p3), %vm280_vm2, %v1183_v0 }
   0xe   : > { %s1391_s12 = smov (!%p242_p4, %s1173_s12), 1 }
   0xf   : > { %s1245_s16 = smul.u32 48, %s1391_s12  ;;  %s1012_s29 = sshll.u32 %s1391_s12, 2 }
  0x10   : > { %v1303_v35 = vld [vmem:[#allocation2] sm:$0xff]  ;;  %v1308_v38 = vld [vmem:[#allocation2 + $0x8] sm:$0xff]  ;;  %s274_s5 = scalar_lea.vmem %s1385_s3, %s1012_s29 }
  0x11   : > { %s945_s19 = scalar_lea.vmem %s1383_s1, %s1245_s16  ;;  %s249_s22 = scalar_lea.vmem %s1382_s0, %s1245_s16  ;;  %v1318_v42 = vld [vmem:[#allocation2 + $0x10] sm:$0xff]  ;;  %v1326_v46 = vld [vmem:[#allocation2 + $0x18] sm:$0xff] }
  0x12   : > { %v1013_v1 = vld [vmem:[%s945_s19 + $0x10] sm:$0xf]  ;;  %v1014_v2 = vld [vmem:[%s945_s19 + $0x14] sm:$0xf]  ;;  %v1015_v5 = vld [vmem:[%s945_s19 + $0x18] sm:$0xf]  ;;  %s950_s25 = scalar_lea.vmem %s1384_s2, %s1245_s16 }
  0x13   : > { %v307_v3 = vsel %vm289_vm0, %v1013_v1, 0  ;;  %v353_v4 = vsel %vm289_vm0, %v1014_v2, 0  ;;  %v1016_v6 = vld [vmem:[%s945_s19 + $0x1c] sm:$0xf]  ;;  %v294_v7 = vld [vmem:[%s249_s22] sm:$0xf] }
  0x14   : > { %1054 = vmatpush3.bf16.xpose.msra.mxu0 %v307_v3  ;;  %1060 = vmatpush3.bf16.xpose.msra.mxu1 %v353_v4  ;;  %v295_v8 = vld [vmem:[%s249_s22 + $0x4] sm:$0xf]  ;;  %v399_v9 = vsel %vm289_vm0, %v1015_v5, 0  ;;  %v445_v10 = vsel %vm289_vm0, %v1016_v6, 0  ;;  %v296_v11 = vld [vmem:[%s249_s22 + $0x8] sm:$0xf] }
  0x15   : > { %1065 = vmatprep.subr.bf16.mxu0 %v1183_v0  ;;  %1071 = vmatprep.subr.bf16.mxu1 %v1183_v0  ;;  %v297_v12 = vld [vmem:[%s249_s22 + $0xc] sm:$0xf]  ;;  %v1021_v51 = vld [vmem:[%s950_s25 + $0x20] sm:$0xf]  ;;  %v1022_v53 = vld [vmem:[%s950_s25 + $0x24] sm:$0xf] }
  0x16   : > { %v593_v52 = vsel %vm591_vm3, %v1021_v51, 0  ;;  %v639_v54 = vsel %vm591_vm3, %v1022_v53, 0  ;;  %v1023_v55 = vld [vmem:[%s950_s25 + $0x28] sm:$0xf]  ;;  %v1024_v57 = vld [vmem:[%s950_s25 + $0x2c] sm:$0xf] }
  0x17   : > { %v685_v56 = vsel %vm591_vm3, %v1023_v55, 0  ;;  %v731_v58 = vsel %vm591_vm3, %v1024_v57, 0  ;;  %v774_v51 = vld [vmem:[#allocation4 + $0x8] sm:$0xff] }
  0x1b   : > { %1056 = vmatmul.mubr.msk.bf16.vlgmr.msra.gmra.mrb[0].mxu0 %vm289_vm0, %v294_v7  ;;  %1062 = vmatmul.mubr.msk.bf16.vlgmr.msra.gmra.mrb[0].mxu1 %vm289_vm0, %v295_v8 }
  0x1c   : > { %1066 = vmatpush3.bf16.xpose.msra.mxu0 %v399_v9  ;;  %1072 = vmatpush3.bf16.xpose.msra.mxu1 %v445_v10 }
  0x1d   : > { %1067 = vmatprep.mubr.msk.bf16.mxu0 %vm1184_vm1, %v1183_v0  ;;  %1073 = vmatprep.mubr.msk.bf16.mxu1 %vm1184_vm1, %v1183_v0 }
  0x1e   : > { %1077 = vmatprep.subr.bf16.mxu0 %v1183_v0  ;;  %1083 = vmatprep.subr.bf16.mxu1 %v1183_v0 }
  0x23   : > { %1068 = vmatmul.mubr.msk.bf16.vlgmr.msra.gmra.mrb[4].mxu0 %vm289_vm0, %v296_v11  ;;  %1074 = vmatmul.mubr.msk.bf16.vlgmr.msra.gmra.mrb[4].mxu1 %vm289_vm0, %v297_v12 }
  0x24   : > { %1079 = vmatprep.mubr.msk.bf16.mxu0 %vm1184_vm1, %v1183_v0  ;;  %1085 = vmatprep.mubr.msk.bf16.mxu1 %vm1184_vm1, %v1183_v0 }
  0x25   : > { %1078 = vmatpush3.bf16.msra.mxu0 %v593_v52  ;;  %1084 = vmatpush3.bf16.msra.mxu1 %v639_v54 }
  0x26   : > { %1089 = vmatprep.subr.bf16.mxu0 %v1183_v0  ;;  %1095 = vmatprep.subr.bf16.mxu1 %v1183_v0 }
  0xee   : > { %v1287_v14 = vpop.f32.mrb[0].mxu0  ;;  %v1289_v15 = vpop.f32.mrb[0].mxu1 }
  0xef   : > { %v1057_v16 = vpop.f32.mrb[1].mxu0  ;;  %v491_v17 = vsel %vm289_vm0, %v1287_v14, -inf  ;;  %v1063_v18 = vpop.f32.mrb[1].mxu1  ;;  %v494_v23 = vsel %vm289_vm0, %v1289_v15, -inf }
  0xf0   : > { %492 = vmax.xlane.f32.xlu0 %v491_v17  ;;  %v346_v19 = vpop.f32.mrb[2].mxu0  ;;  %v392_v20 = vpop.f32.mrb[2].mxu1 }
  0xf1   : > { %v1058_v21 = vpop.f32.mrb[3].mxu0  ;;  %v1064_v22 = vpop.f32.mrb[3].mxu1 }
  0xf4   : > { %495 = vmax.xlane.f32.xlu0 %v494_v23 }
  0xf6   : > { %v1295_v24 = vpop.f32.mrb[4].mxu0  ;;  %v1297_v25 = vpop.f32.mrb[4].mxu1 }
  0xf7   : > { %v1069_v26 = vpop.f32.mrb[5].mxu0  ;;  %v497_v27 = vsel %vm289_vm0, %v1295_v24, -inf  ;;  %v1075_v28 = vpop.f32.mrb[5].mxu1  ;;  %v500_v33 = vsel %vm289_vm0, %v1297_v25, -inf }
  0xf8   : > { %498 = vmax.xlane.f32.xlu1 %v497_v27  ;;  %v438_v29 = vpop.f32.mrb[6].mxu0  ;;  %v484_v30 = vpop.f32.mrb[6].mxu1  ;;  %v552_v26 = vld [vmem:[#allocation3 + $0x8] sm:$0xff] }
  0xf9   : > { %v1070_v31 = vpop.f32.mrb[7].mxu0  ;;  %v1076_v32 = vpop.f32.mrb[7].mxu1  ;;  %v553_v29 = vld [vmem:[#allocation3 + $0x10] sm:$0xff] }
  0xfc   : > { %501 = vmax.xlane.f32.xlu1 %v500_v33  ;;  %v554_v33 = vld [vmem:[#allocation3 + $0x18] sm:$0xff] }
 0x17d   : > { %v493_v36 = vpop.xlane.xlu0 %492 }
 0x17e   : > { %v1306_v37 = vmax.f32 %v1303_v35, %v493_v36 }
 0x180   : > { %v507_v39 = vsub.f32 %v1303_v35, %v1306_v37  ;;  %809 = vst.msk [vmem:[#allocation2] sm:$0xff] %vm280_vm2, %v1306_v37  ;;  %521 = vperm.xlu0 %1133, %v1306_v37  }
 0x181   : > { %v496_v40 = vpop.xlane.xlu0 %495 }
 0x182   : > { %v1316_v41 = vmax.f32 %v1308_v38, %v496_v40 }
 0x184   : > { %v508_v43 = vsub.f32 %v1308_v38, %v1316_v41  ;;  %810 = vst.msk [vmem:[#allocation2 + $0x8] sm:$0xff] %vm280_vm2, %v1316_v41  ;;  %526 = vperm.xlu1 %1134, %v1316_v41   ;;  %v551_v41 = vld [vmem:[#allocation3] sm:$0xff] }
 0x185   : > { %v499_v44 = vpop.xlane.xlu1 %498 }
 0x186   : > { %v505_v45 = vmax.f32 %v1318_v42, %v499_v44 }
 0x188   : > { %v509_v47 = vsub.f32 %v1318_v42, %v505_v45  ;;  %811 = vst.msk [vmem:[#allocation2 + $0x10] sm:$0xff] %vm280_vm2, %v505_v45  ;;  %531 = vperm.xlu1 %1134, %v505_v45  }
 0x189   : > { %v502_v48 = vpop.xlane.xlu1 %501 }
 0x18a   : > { %v506_v49 = vmax.f32 %v1326_v46, %v502_v48  ;;  %v515_v19 = vmul.f32 1.442695, %v509_v47 }
 0x18c   : > { %v510_v50 = vsub.f32 %v1326_v46, %v506_v49  ;;  %812 = vst.msk [vmem:[#allocation2 + $0x18] sm:$0xff] %vm280_vm2, %v506_v49  ;;  %536 = vperm.xlu1 %1134, %v506_v49  }
 0x18e   : > { %v517_v21 = vmul.f32 1.442695, %v510_v50 }
 0x1ff   : > { %v522_v59 = vpop.permute.xlu0 %521 }
 0x200   : > { %v539_v60 = vsub.f32 %v1287_v14, %v522_v59 }
 0x202   : > { %v543_v61 = vmul.f32 1.442695, %v539_v60 }
 0x203   : > { %v527_v62 = vpop.permute.xlu1 %526 }
 0x204   : > { %1135 = vpow2.f32 %v543_v61  ;;  %v540_v63 = vsub.f32 %v1289_v15, %v527_v62 }
 0x206   : > { %v545_v1 = vmul.f32 1.442695, %v540_v63 }
 0x207   : > { %v532_v2 = vpop.permute.xlu1 %531 }
 0x208   : > { %1137 = vpow2.f32 %v545_v1  ;;  %v541_v3 = vsub.f32 %v1295_v24, %v532_v2 }
 0x20a   : > { %v547_v4 = vmul.f32 1.442695, %v541_v3  ;;  %v776_v3 = vld [vmem:[#allocation4 + $0x18] sm:$0xff] }
 0x20b   : > { %v537_v5 = vpop.permute.xlu1 %536 }
 0x20c   : > { %1139 = vpow2.f32 %v547_v4  ;;  %v542_v6 = vsub.f32 %v1297_v25, %v537_v5  ;;  %v511_v25 = vmul.f32 1.442695, %v507_v39 }
 0x20e   : > { %v1136_v7 = vpop.eup %1135  ;;  %v549_v8 = vmul.f32 1.442695, %v542_v6 }
 0x20f   : > { %v580_v9 = vpack.c.bf16 %v1136_v7, %v1136_v7  ;;  %v559_v20 = vsel %vm289_vm0, %v1136_v7, 0.0 }
 0x210   : > { %1141 = vpow2.f32 %v549_v8 }
 0x211   : > { %1080 = vmatmul.mubr.msk.bf16.vlgmr.msra.gmra.mrb[8].mxu0 %vm289_vm0, %v580_v9  ;;  %1143 = vpow2.f32 %v515_v19 }
 0x212   : > { %v1138_v10 = vpop.eup %1137  ;;  %1090 = vmatpush3.bf16.msra.mxu0 %v685_v56  ;;  %1091 = vmatprep.mubr.msk.bf16.mxu0 %vm1184_vm1, %v1183_v0 }
 0x213   : > { %v562_v11 = vsel %vm289_vm0, %v1138_v10, 0.0  ;;  %v581_v12 = vpack.c.bf16 %v1138_v10, %v1138_v10 }
 0x214   : > { %563 = vadd.xlane.f32.xlu1 %v562_v11 }
 0x215   : > { %1086 = vmatmul.mubr.msk.bf16.vlgmr.msra.gmra.mrb[8].mxu1 %vm289_vm0, %v581_v12 }
 0x216   : > { %v1140_v13 = vpop.eup %1139  ;;  %1096 = vmatpush3.bf16.msra.mxu1 %v731_v58  ;;  %1097 = vmatprep.mubr.msk.bf16.mxu1 %vm1184_vm1, %v1183_v0  ;;  %v513_v0 = vmul.f32 1.442695, %v508_v43  ;;  %v775_v58 = vld [vmem:[#allocation4 + $0x10] sm:$0xff] }
 0x217   : > { %v565_v14 = vsel %vm289_vm0, %v1140_v13, 0.0  ;;  %v582_v15 = vpack.c.bf16 %v1140_v13, %v1140_v13 }
 0x218   : > { %566 = vadd.xlane.f32.xlu0 %v565_v14  ;;  %1145 = vpow2.f32 %v513_v0 }
 0x219   : > { %1092 = vmatmul.mubr.msk.bf16.vlgmr.msra.gmra.mrb[12].mxu0 %vm289_vm0, %v582_v15  ;;  %1147 = vpow2.f32 %v517_v21 }
 0x21a   : > { %v1142_v16 = vpop.eup %1141  ;;  %1149 = vpow2.f32 %v511_v25 }
 0x21b   : > { %v568_v17 = vsel %vm289_vm0, %v1142_v16, 0.0  ;;  %v583_v18 = vpack.c.bf16 %v1142_v16, %v1142_v16  ;;  %v1144_v22 = vpop.eup %1143 }
 0x21c   : > { %569 = vadd.xlane.f32.xlu1 %v568_v17  ;;  %v557_v31 = vmul.f32 %v1144_v22, %v553_v29 }
 0x21d   : > { %1098 = vmatmul.mubr.msk.bf16.vlgmr.msra.gmra.mrb[12].mxu1 %vm289_vm0, %v583_v18 }
 0x220   : > { %560 = vadd.xlane.f32.xlu1 %v559_v20 }
 0x222   : > { %v1146_v23 = vpop.eup %1145 }
 0x223   : > { %v1148_v24 = vpop.eup %1147  ;;  %v556_v27 = vmul.f32 %v1146_v23, %v552_v26 }
 0x224   : > { %v558_v36 = vmul.f32 %v1148_v24, %v554_v33  ;;  %v1150_v38 = vpop.eup %1149 }
 0x225   : > { %v555_v39 = vmul.f32 %v1150_v38, %v551_v41 }
 0x22e   : > { %789 = vperm.xlu0 %1133, %v1144_v22   ;;  %v773_v22 = vld [vmem:[#allocation4] sm:$0xff] }
 0x231   : > { %784 = vperm.xlu1 %1134, %v1146_v23  }
 0x235   : > { %794 = vperm.xlu1 %1134, %v1148_v24  }
 0x2a1   : > { %v564_v28 = vpop.xlane.xlu1 %563 }
 0x2a2   : > { %v572_v30 = vadd.f32 %v564_v28, %v556_v27 }
 0x2a4   : > { %577 = vst.msk [vmem:[#allocation3 + $0x8] sm:$0xff] %vm280_vm2, %v572_v30 }
 0x2a5   : > { %v567_v32 = vpop.xlane.xlu0 %566 }
 0x2a6   : > { %v573_v34 = vadd.f32 %v567_v32, %v557_v31 }
 0x2a8   : > { %578 = vst.msk [vmem:[#allocation3 + $0x10] sm:$0xff] %vm280_vm2, %v573_v34 }
 0x2a9   : > { %v570_v40 = vpop.xlane.xlu1 %569 }
 0x2aa   : > { %v574_v35 = vadd.f32 %v570_v40, %v558_v36 }
 0x2ab   : > { %v817_v37 = vld [vmem:[#allocation3 + $0x8] sm:$0xff] }
 0x2ac   : > { %579 = vst.msk [vmem:[#allocation3 + $0x18] sm:$0xff] %vm280_vm2, %v574_v35  ;;  %1151 = vrcp.f32 %v817_v37 }
 0x2ad   : > { %v561_v42 = vpop.xlane.xlu1 %560  ;;  %v790_v59 = vpop.permute.xlu0 %789 }
 0x2ae   : > { %v571_v43 = vadd.f32 %v561_v42, %v555_v39  ;;  %v799_v1 = vmul.f32 %v790_v59, %v775_v58 }
 0x2af   : > { %v818_v44 = vld [vmem:[#allocation3 + $0x10] sm:$0xff] }
 0x2b0   : > { %576 = vst.msk [vmem:[#allocation3] sm:$0xff] %vm280_vm2, %v571_v43  ;;  %1153 = vrcp.f32 %v818_v44 }
 0x2b1   : > { %v785_v52 = vpop.permute.xlu1 %784 }
 0x2b2   : > { %v798_v56 = vmul.f32 %v785_v52, %v774_v51 }
 0x2b3   : > { %v819_v45 = vld [vmem:[#allocation3 + $0x18] sm:$0xff] }
 0x2b4   : > { %1155 = vrcp.f32 %v819_v45 }
 0x2b5   : > { %v795_v4 = vpop.permute.xlu1 %794 }
 0x2b6   : > { %v1152_v46 = vpop.eup %1151  ;;  %v800_v9 = vmul.f32 %v795_v4, %v776_v3 }
 0x2b7   : > { %835 = vperm.xlu1 %1134, %v1152_v46   ;;  %v816_v47 = vld [vmem:[#allocation3] sm:$0xff] }
 0x2b8   : > { %1157 = vrcp.f32 %v816_v47 }
 0x2ba   : > { %v1154_v48 = vpop.eup %1153 }
 0x2bb   : > { %840 = vperm.xlu1 %1134, %v1154_v48  }
 0x2be   : > { %v1156_v49 = vpop.eup %1155 }
 0x2bf   : > { %779 = vperm.xlu1 %1134, %v1150_v38   ;;  %845 = vperm.xlu0 %1133, %v1156_v49  }
 0x2c2   : > { %v1158_v50 = vpop.eup %1157 }
 0x2c3   : > { %830 = vperm.xlu0 %1133, %v1158_v50  }
 0x2e4   : > { %v629_v53 = vpop.f32.mrb[8].mxu0 }
 0x2e5   : > { %v1081_v54 = vpop.f32.mrb[9].mxu0 }
 0x2e6   : > { %v632_v55 = vpop.f32.mrb[10].mxu0 }
 0x2e7   : > { %v1082_v57 = vpop.f32.mrb[11].mxu0 }
 0x2e8   : > { %v675_v60 = vpop.f32.mrb[8].mxu1 }
 0x2e9   : > { %v802_v61 = vadd.f32 %v798_v56, %v675_v60  ;;  %v1087_v62 = vpop.f32.mrb[9].mxu1 }
 0x2ea   : > { %v678_v63 = vpop.f32.mrb[10].mxu1 }
 0x2eb   : > { %806 = vst.msk [vmem:[#allocation4 + $0x8] sm:$0xff] %vm289_vm0, %v802_v61  ;;  %v1088_v2 = vpop.f32.mrb[11].mxu1 }
 0x2ec   : > { %v721_v5 = vpop.f32.mrb[12].mxu0 }
 0x2ed   : > { %v803_v6 = vadd.f32 %v799_v1, %v721_v5  ;;  %v1093_v7 = vpop.f32.mrb[13].mxu0 }
 0x2ee   : > { %v724_v8 = vpop.f32.mrb[14].mxu0 }
 0x2ef   : > { %807 = vst.msk [vmem:[#allocation4 + $0x10] sm:$0xff] %vm289_vm0, %v803_v6  ;;  %v1094_v10 = vpop.f32.mrb[15].mxu0 }
 0x2f0   : > { %v767_v11 = vpop.f32.mrb[12].mxu1 }
 0x2f1   : > { %v804_v12 = vadd.f32 %v800_v9, %v767_v11  ;;  %v1099_v13 = vpop.f32.mrb[13].mxu1 }
 0x2f2   : > { %v770_v14 = vpop.f32.mrb[14].mxu1  ;;  %v825_v16 = vld [vmem:[#allocation4 + $0x8] sm:$0xff] }
 0x2f3   : > { %808 = vst.msk [vmem:[#allocation4 + $0x18] sm:$0xff] %vm289_vm0, %v804_v12  ;;  %v1100_v15 = vpop.f32.mrb[15].mxu1 }
 0x2f6   : > { %v826_v0 = vld [vmem:[#allocation4 + $0x10] sm:$0xff] }
 0x2fa   : > { %v827_v25 = vld [vmem:[#allocation4 + $0x18] sm:$0xff] }
 0x336   : > { %v836_v17 = vpop.permute.xlu1 %835 }
 0x337   : > { %v849_v18 = vmul.f32 %v836_v17, %v825_v16 }
 0x339   : > { %v1034_v19 = vpack.c.bf16 %v849_v18, %v849_v18 }
 0x33a   : > { %v841_v20 = vpop.permute.xlu1 %840 }
 0x33b   : > { %v850_v21 = vmul.f32 %v841_v20, %v826_v0  ;;  %859 = vrot.lane.b32.xlu1 %v1034_v19, %s1187_s26 }
 0x33d   : > { %v1035_v23 = vpack.c.bf16 %v850_v21, %v850_v21 }
 0x33e   : > { %v846_v24 = vpop.permute.xlu0 %845  ;;  %v780_v26 = vpop.permute.xlu1 %779 }
 0x33f   : > { %v851_v27 = vmul.f32 %v846_v24, %v827_v25  ;;  %v797_v28 = vmul.f32 %v780_v26, %v773_v22  ;;  %868 = vrot.lane.b32.xlu0 %v1035_v23, %s1188_s27 }
 0x341   : > { %v1036_v29 = vpack.c.bf16 %v851_v27, %v851_v27  ;;  %v801_v30 = vadd.f32 %v797_v28, %v629_v53 }
 0x342   : > { %v831_v31 = vpop.permute.xlu0 %830 }
 0x343   : > { %805 = vst.msk [vmem:[#allocation4] sm:$0xff] %vm289_vm0, %v801_v30  ;;  %877 = vrot.lane.b32.xlu1 %v1036_v29, %s1189_s28 }
 0x34a   : > { %v824_v32 = vld [vmem:[#allocation4] sm:$0xff] }
 0x34b   : > { %v848_v33 = vmul.f32 %v831_v31, %v824_v32 }
 0x34d   : > { %v852_v34 = vpack.c.bf16 %v848_v33, %v848_v33 }
 0x34f   : > { %854 = vst.msk [vmem:[%s274_s5] sm:$0xf] %vm853_vm4, %v852_v34 }
 0x3ad   : > { %v860_v36 = vpop.permute.xlu1 %859 }
 0x3ae   : > { %863 = vst.msk [vmem:[%s274_s5] sm:$0xf] %vm862_vm5, %v860_v36 }
 0x3b1   : > { %v869_v38 = vpop.permute.xlu0 %868 }
 0x3b2   : > { %872 = vst.msk [vmem:[%s274_s5] sm:$0xf] %vm871_vm6, %v869_v38 }
 0x3b5   : > { %v878_v40 = vpop.permute.xlu1 %877 }
 0x3b6   : > { %881 = vst.msk [vmem:[%s274_s5] sm:$0xf] %vm880_vm7, %v878_v40 }
 0x3b7 PF: > { %s13_s14 = sadd.s32 1, %s1181_s14   ;;  %s1386_s12 = smov %s1177_s13 }
 0x3b8   : > { %p10_p5 = scmp.ge.s32.totalorder %s13_s14, 4   ;;  %s1387_s13 = smov %s1389_s15 }
 0x3ba   :  { %12 = sbr.rel (!%p10_p5) target bundleno = 2 (0x2), region = 76 }

</bundles_post_ra>
